<compile_context>
chip_gen: v5e
topology: v5e:2x2
jax: 0.10.0
libtpu: 0.0.40
codegen_flags: <defaults>
</compile_context>

<pallas_src>
import jax
import jax.numpy as jnp
from jax.experimental import pallas as pl
from jax.experimental.pallas import tpu as pltpu


def _round_up(x: int, m: int) -> int:
    return ((x + m - 1) // m) * m


def _pick_row_tile(m: int, tm_max: int) -> int:
    """Row tile: multiple of 8 (f32 sublanes) and never larger than M (>8)."""
    if m <= 8:
        return m                      # equal-to-full-dim case
    return min(tm_max, (m // 8) * 8)


def _pick_col_tile(embed_dim: int, tn_max: int) -> int:
    """Column tile: multiple of 128 when possible, NEVER larger than tn_max."""
    if embed_dim <= tn_max:
        return embed_dim              # full dim block (allowed by Pallas)
    cap = max(128, (tn_max // 128) * 128)
    t = cap
    while t >= 128:
        if embed_dim % t == 0:
            return t                  # clean divisor -> no masked tail column
        t -= 128
    return cap                        # ragged tail column block (masked)


def _joint_embed_kernel(x_ref, w_ref, b_ref, o_ref):
    # x_ref: (TM, 2)   w_ref: (2, TN)   b_ref: (1, TN)   o_ref: (TM, TN)
    x = x_ref[...].astype(jnp.float32)
    w = w_ref[...].astype(jnp.float32)
    b = b_ref[...].astype(jnp.float32)
    # K=2 contraction as two VPU FMAs + bias (MXU skipped on purpose).
    out = x[:, 0:1] * w[0:1, :] + x[:, 1:2] * w[1:2, :] + b
    o_ref[...] = out.astype(o_ref.dtype)


def skeleton_graph_representation(joint_coords, weight, bias, bones=None, *,
                                  tm_max=1024, tn_max=512,
                                  min_rows_for_pallas=4096, use_pallas=None):
    """
    joint_coords: (B, J, 2) float
    weight:       (embed_dim, 2)  -- PyTorch nn.Linear layout (out, in)
    bias:         (embed_dim,)
    bones:        ignored (the reference forward never uses it)
    returns       (B, J, embed_dim) float32
    """
    B, J, K = joint_coords.shape
    E, K_w = weight.shape
    assert K == 2 and K_w == 2, "joint coords / Linear in_features must be 2"

    M = B * J
    x = joint_coords.reshape(M, K)

    if use_pallas is None:
        use_pallas = M >= min_rows_for_pallas

    if not use_pallas:
        # Tiny workload: plain XLA fuses this trivially; kernel launch overhead
        # would dominate (see perf review).
        out = (jnp.einsum("mk,ek->me", x.astype(jnp.float32),
                          weight.astype(jnp.float32))
               + bias.astype(jnp.float32))
        return out.reshape(B, J, E)

    w = jnp.transpose(weight)          # (2, E)
    b = bias.reshape(1, E)             # (1, E)

    tm = _pick_row_tile(M, tm_max)
    tn = _pick_col_tile(E, tn_max)

    n_row = pl.cdiv(M, tm)
    n_col = pl.cdiv(E, tn)
    # Columns outer, rows inner: w/b blocks stay resident across the row sweep.
    grid = (n_col, n_row)

    # VMEM budget: double-buffered out + x (lane-padded 2->128) + w/b, headroom.
    out_blk = tm * tn * 4
    x_blk = tm * 128 * 4
    wb_blk = 2 * 8 * _round_up(tn, 128) * 4
    vmem_limit = min(int(2 * (out_blk + x_blk + wb_blk) + (8 << 20)), 48 << 20)

    cost = pl.CostEstimate(
        flops=4 * M * E,                                  # 2 mul + 2 add / elem
        transcendentals=0,
        bytes_accessed=4 * (M * E + 2 * M + 2 * E + E),   # out + x + w + b
    )

    out = pl.pallas_call(
        _joint_embed_kernel,
        out_shape=jax.ShapeDtypeStruct((M, E), jnp.float32),
        grid_spec=pltpu.PrefetchScalarGridSpec(
            num_scalar_prefetch=0,
            grid=grid,
            in_specs=[
                pl.BlockSpec((tm, K), lambda j, i: (i, 0)),   # coord rows
                pl.BlockSpec((K, tn), lambda j, i: (0, j)),   # weight cols
                pl.BlockSpec((1, tn), lambda j, i: (0, j)),   # bias slice
            ],
            out_specs=pl.BlockSpec((tm, tn), lambda j, i: (i, j)),
        ),
        compiler_params=pltpu.CompilerParams(
            dimension_semantics=("parallel", "parallel"),
            vmem_limit_bytes=vmem_limit,
        ),
        cost_estimate=cost,
    )(x, w, b)

    return out.reshape(B, J, E)


if __name__ == "__main__":
    # Small shapes consistent with the module: batch=2, 17 joints (COCO-style
    # skeleton), embed_dim=256 (module default).
    B, J, E = 2, 17, 256

    key = jax.random.PRNGKey(0)
    k1, k2, k3 = jax.random.split(key, 3)
    joint_coords = jax.random.normal(k1, (B, J, 2), dtype=jnp.float32)

    # nn.Linear(2, E) parameters in PyTorch layout.
    bound = 1.0 / (2.0 ** 0.5)
    weight = jax.random.uniform(k2, (E, 2), minval=-bound, maxval=bound,
                                dtype=jnp.float32)
    bias = jax.random.uniform(k3, (E,), minval=-bound, maxval=bound,
                              dtype=jnp.float32)

    # bones is accepted but unused, exactly like the reference forward.
    bones = jnp.zeros((J, J), dtype=jnp.float32)

    ref = jnp.einsum("bjk,ek->bje", joint_coords, weight) + bias

    # Force the Pallas path so the kernel itself is compiled and exercised
    # (ragged row block: M=34 -> tm=32, grid rows=2).
    out_pallas = jax.block_until_ready(
        skeleton_graph_representation(joint_coords, weight, bias, bones,
                                      use_pallas=True))
    assert out_pallas.shape == (B, J, E)
    assert jnp.allclose(out_pallas, ref, atol=1e-5, rtol=1e-5)

    # Auto-dispatch path (small M -> plain XLA fallback per perf review).
    out_auto = jax.block_until_ready(
        skeleton_graph_representation(joint_coords, weight, bias, bones))
    assert jnp.allclose(out_auto, ref, atol=1e-5, rtol=1e-5)

    print("KERNEL_OK")
</pallas_src>

<mosaic_0001>
module attributes {stable_mosaic.version = 11 : i64} {
  func.func @_joint_embed_kernel(%arg0: i32, %arg1: i32, %arg2: memref<32x2xf32, #tpu.memory_space<vmem>>, %arg3: memref<2x256xf32, #tpu.memory_space<vmem>>, %arg4: memref<1x256xf32, #tpu.memory_space<vmem>>, %arg5: memref<32x256xf32, #tpu.memory_space<vmem>>) attributes {dimension_semantics = [#tpu.dimension_semantics<parallel>, #tpu.dimension_semantics<parallel>], iteration_bounds = array<i64: 1, 2>, scalar_prefetch = 0 : i64, scratch_operands = 0 : i64, tpu.core_type = #tpu.core_type<tc>, window_params = [{transform_indices = @transform_0, window_bounds = array<i64: 32, 2>}, {transform_indices = @transform_1, window_bounds = array<i64: 2, 256>}, {transform_indices = @transform_2, window_bounds = array<i64: 1, 256>}, {transform_indices = @transform_3, window_bounds = array<i64: 32, 256>}]} {
    %c0 = arith.constant 0 : index
    %c0_0 = arith.constant 0 : index
    %0 = vector.load %arg2[%c0, %c0_0] : memref<32x2xf32, #tpu.memory_space<vmem>>, vector<32x2xf32>
    %c0_1 = arith.constant 0 : index
    %c0_2 = arith.constant 0 : index
    %1 = vector.load %arg3[%c0_1, %c0_2] : memref<2x256xf32, #tpu.memory_space<vmem>>, vector<2x256xf32>
    %c0_3 = arith.constant 0 : index
    %c0_4 = arith.constant 0 : index
    %2 = vector.load %arg4[%c0_3, %c0_4] : memref<1x256xf32, #tpu.memory_space<vmem>>, vector<1x256xf32>
    %3 = vector.extract_strided_slice %0 {offsets = [0, 0], sizes = [32, 1], strides = [1, 1]} : vector<32x2xf32> to vector<32x1xf32>
    %4 = vector.extract_strided_slice %1 {offsets = [0, 0], sizes = [1, 256], strides = [1, 1]} : vector<2x256xf32> to vector<1x256xf32>
    %5 = vector.broadcast %3 : vector<32x1xf32> to vector<32x256xf32>
    %6 = vector.broadcast %4 : vector<1x256xf32> to vector<32x256xf32>
    %7 = arith.mulf %5, %6 : vector<32x256xf32>
    %8 = vector.extract_strided_slice %0 {offsets = [0, 1], sizes = [32, 1], strides = [1, 1]} : vector<32x2xf32> to vector<32x1xf32>
    %9 = vector.extract_strided_slice %1 {offsets = [1, 0], sizes = [1, 256], strides = [1, 1]} : vector<2x256xf32> to vector<1x256xf32>
    %10 = vector.broadcast %8 : vector<32x1xf32> to vector<32x256xf32>
    %11 = vector.broadcast %9 : vector<1x256xf32> to vector<32x256xf32>
    %12 = arith.mulf %10, %11 : vector<32x256xf32>
    %13 = arith.addf %7, %12 : vector<32x256xf32>
    %14 = vector.broadcast %2 : vector<1x256xf32> to vector<32x256xf32>
    %15 = arith.addf %13, %14 : vector<32x256xf32>
    %c0_5 = arith.constant 0 : index
    %c0_6 = arith.constant 0 : index
    %16 = vector.load %arg5[%c0_5, %c0_6] : memref<32x256xf32, #tpu.memory_space<vmem>>, vector<32x256xf32>
    tpu.vector_store %arg5[%c0_5, %c0_6], %15 {strides = array<i32>} : memref<32x256xf32, #tpu.memory_space<vmem>>, vector<32x256xf32>,
    return
  }
  func.func @transform_0(%arg0: i32, %arg1: i32) -> (i32, i32) {
    %c0_i32 = arith.constant 0 : i32
    %c0_i32_0 = arith.constant 0 : i32
    return %arg1, %c0_i32 : i32, i32
  }
  func.func @transform_1(%arg0: i32, %arg1: i32) -> (i32, i32) {
    %c0_i32 = arith.constant 0 : i32
    %c0_i32_0 = arith.constant 0 : i32
    return %c0_i32, %arg0 : i32, i32
  }
  func.func @transform_2(%arg0: i32, %arg1: i32) -> (i32, i32) {
    %c0_i32 = arith.constant 0 : i32
    %c0_i32_0 = arith.constant 0 : i32
    return %c0_i32, %arg0 : i32, i32
  }
  func.func @transform_3(%arg0: i32, %arg1: i32) -> (i32, i32) {
    %c0_i32 = arith.constant 0 : i32
    return %arg1, %arg0 : i32, i32
  }
}

</mosaic_0001>

<bundles_post_ra>
// kernel: tpu_custom_call.1
= control target key start
LH: loop header
LB: loop body
LE: loop exit
PB: predicated region body
PF: predicated region fallthrough
CT: control target
= control target key end

     0   :  { %8 = vsyncpa [#allocation3], 0  ;;  %s833_s0 = inlined_call_operand.vmem [shape: f32[34,2], index: 0, kind: input, shape index: {}]   ;;  %s834_s1 = inlined_call_operand.vmem [shape: f32[2,256], index: 1, kind: input, shape index: {}]   ;;  %s835_s2 = inlined_call_operand.vmem [shape: f32[1,256], index: 2, kind: input, shape index: {}]   ;;  %s836_s3 = inlined_call_operand.hbm [shape: f32[34,256], index: 3, kind: output, shape index: {}]  }
   0x1   :  { %10 = vsyncpa [#allocation3 + $0x1], 0  ;;  %s683_s12 = smov 0   ;;  %s685_s13 = smov 0  }
   0x2   :  { %s687_s14 = smov 0   ;;  %s689_s15 = smov 0  }
   0x3   :  { %s691_s16 = smov 0   ;;  %s693_s17 = smov 0  }
   0x4 LB: > { %s480_s18 = sadd.s32 4294967295, %s656_s17   ;;  %s481_s19 = sadd.s32 4294967294, %s656_s17   ;;  %s656_s17 = sphi %s693_s17, %s16_s17   ;;  %s652_s16 = sphi %s691_s16, %s844_s16   ;;  %s648_s15 = sphi %s689_s15, %s843_s15   ;;  %s644_s14 = sphi %s687_s14, %s842_s14   ;;  %s640_s13 = sphi %s685_s13, %s841_s13   ;;  %s636_s12 = sphi %s683_s12, %s840_s12  }
   0x5   : > { %s25_s20 = sadd.s32 1, %s652_s16  ;;  %s115_s21 = sadd.s32 1, %s644_s14 }
   0x6   : > { %p26_p0 = scmp.ge.s32.totalorder %s25_s20, 2  ;;  %p125_p1 = scmp.ne.s32.totalorder %s644_s14, %s640_s13 }
   0x7   : > { %p126_p2 = scmp.eq.s32.totalorder %s480_s18, 1  ;;  %p131_p3 = scmp.ne.s32.totalorder %s640_s13, %s636_s12 }
   0x8   : > { %s846_s20 = smov (%p26_p0, %s25_s20), 0  ;;  %p132_p5 = scmp.eq.s32.totalorder %s481_s19, 1 }
   0x9   : > { %p723_p4 = por %p126_p2, %p125_p1  ;;  %s110_s23 = ssub.s32 %s652_s16, %s846_s20 }
   0xa   : > { %p486_p6 = scmp.ge.s32.totalorder %s656_s17, 1  ;;  %p113_p7 = scmp.eq.s32.totalorder %s110_s23, 0 }
   0xb   : > { %p730_p8 = por %p132_p5, %p131_p3  ;;  %p184_p9 = scmp.lt.s32.totalorder %s656_s17, 3 }
   0xc   : > { %s736_s25 = scalar_select %p113_p7, %s644_s14, %s115_s21  }
   0xd   : > { %p185_p10 = pnand %p486_p6, %p184_p9 }
   0xe   : > { %s739_s26 = sshll.u32 (!%p185_p10), %s648_s15, 2  ;;  %s218_s27 = sand.u32 (!%p185_p10), 1, %s640_s13  }
   0xf   : > { %188 = sbr.rel (%p185_p10) target bundleno = 198 (0xc6), region = 32  ;;  %p226_p11 = scmp.lt.s32.totalorder (!%p185_p10), %s739_s26, 4 }
  0x10   : > { %s487_s10 = sshll.u32 (!%p185_p10), %s218_s27, 6  ;;  %s767_s18 = scalar_lea.sflag (!%p185_p10), [#allocation3], %s218_s27 }
  0x11   : > { %s755_s11 = scalar_lea.vmem (!%p185_p10), [#allocation2], %s487_s10 }
  0x14   : > { %v658_v0 = vmov 0   ;;  %v659_v1 = vmov 1   ;;  %s227_s28 = scalar_select %p226_p11, %s739_s26, 4  ;;  %v257_v6 = vld [vmem:[%s834_s1] sm:$0xf] }
  0x15   : > { %563 = vset.pattern.permute.xlu1 %v658_v0  ;;  %562 = vset.pattern.permute.xlu0 %v658_v0  ;;  %v310_v7 = vperm.slane %v257_v6, 1  ;;  %v311_v8 = vperm.slane %v257_v6, 3  ;;  %v280_v9 = vperm.slane %v257_v6, 0  ;;  %v281_v10 = vperm.slane %v257_v6, 2  ;;  %v258_v16 = vld [vmem:[%s835_s2] sm:$0x3] }
  0x16   : > { %564 = vset.pattern.permute.xlu2 %v659_v1  ;;  %s489_s29 = sshll.u32 %s227_s28, 3  ;;  %v333_v21 = vperm.slane %v258_v16, 0  ;;  %v334_v22 = vperm.slane %v258_v16, 1  ;;  %s363_s19 = ssub.s32 (%p723_p4), 5, %s739_s26 }
  0x17   : > { %s229_s5 = scalar_lea.vmem %s833_s0, %s489_s29  ;;  %v314_v12 = vperm.slane %v310_v7, 1  ;;  %v315_v13 = vperm.slane %v311_v8, 1  ;;  %v284_v14 = vperm.slane %v280_v9, 0  ;;  %v285_v15 = vperm.slane %v281_v10, 0  ;;  %p364_p12 = scmp.lt.s32.totalorder (%p723_p4), %s363_s19, 4 }
  0x18   : > { %v255_v2 = vld [vmem:[%s229_s5 + $0x10] sm:$0xff]  ;;  %v253_v3 = vld [vmem:[%s229_s5] sm:$0xff]  ;;  %v256_v4 = vld [vmem:[%s229_s5 + $0x18] sm:$0xff] }
  0x19   : > { %271 = vperm.xlu1 %563, %v255_v2   ;;  %261 = vperm.xlu0 %562, %v253_v3   ;;  %v254_v5 = vld [vmem:[%s229_s5 + $0x8] sm:$0xff] }
  0x1a   : > { %295 = vperm.xlu2 %564, %v253_v3  }
  0x21   : > { %276 = vperm.xlu1 %563, %v256_v4   ;;  %266 = vperm.xlu0 %562, %v254_v5  }
  0x22   : > { %299 = vperm.xlu2 %564, %v254_v5  }
  0x29   : > { %566 = vset.pattern.permute.xlu1 %v659_v1  ;;  %565 = vset.pattern.permute.xlu0 %v659_v1 }
  0x2a   : > { %307 = vperm.xlu1 %566, %v256_v4   ;;  %303 = vperm.xlu0 %565, %v255_v2  }
  0x74   : > { %v296_v11 = vpop.permute.xlu2 %295 }
  0x75   : > { %v316_v17 = vmul.f32 %v314_v12, %v296_v11  ;;  %v317_v18 = vmul.f32 %v315_v13, %v296_v11 }
  0x7c   : > { %v300_v27 = vpop.permute.xlu2 %299 }
  0x7d   : > { %v318_v30 = vmul.f32 %v314_v12, %v300_v27  ;;  %v319_v31 = vmul.f32 %v315_v13, %v300_v27 }
  0x8b   : > { %v272_v19 = vpop.permute.xlu1 %271  ;;  %v262_v20 = vpop.permute.xlu0 %261 }
  0x8c   : > { %v286_v23 = vmul.f32 %v284_v14, %v262_v20  ;;  %v287_v24 = vmul.f32 %v285_v15, %v262_v20  ;;  %v290_v40 = vmul.f32 %v284_v14, %v272_v19  ;;  %v291_v41 = vmul.f32 %v285_v15, %v272_v19 }
  0x8e   : > { %v324_v25 = vadd.f32 %v316_v17, %v286_v23  ;;  %v325_v26 = vadd.f32 %v317_v18, %v287_v24 }
  0x90   : > { %v337_v28 = vadd.f32 %v333_v21, %v324_v25  ;;  %v338_v29 = vadd.f32 %v334_v22, %v325_v26 }
  0x92   : > { %345 = vst [vmem:[%s755_s11] sm:$0xff] %v337_v28 }
  0x93   : > { %346 = vst [vmem:[%s755_s11 + $0x8] sm:$0xff] %v338_v29  ;;  %v277_v32 = vpop.permute.xlu1 %276  ;;  %v267_v33 = vpop.permute.xlu0 %266 }
  0x94   : > { %v288_v34 = vmul.f32 %v284_v14, %v267_v33  ;;  %v289_v35 = vmul.f32 %v285_v15, %v267_v33  ;;  %v292_v42 = vmul.f32 %v284_v14, %v277_v32  ;;  %v293_v43 = vmul.f32 %v285_v15, %v277_v32 }
  0x96   : > { %v326_v36 = vadd.f32 %v318_v30, %v288_v34  ;;  %v327_v37 = vadd.f32 %v319_v31, %v289_v35 }
  0x98   : > { %v339_v38 = vadd.f32 %v333_v21, %v326_v36  ;;  %v340_v39 = vadd.f32 %v334_v22, %v327_v37 }
  0x9a   : > { %347 = vst [vmem:[%s755_s11 + $0x10] sm:$0xff] %v339_v38 }
  0x9b   : > { %348 = vst [vmem:[%s755_s11 + $0x18] sm:$0xff] %v340_v39 }
  0x9c   : > { %v308_v44 = vpop.permute.xlu1 %307  ;;  %v304_v45 = vpop.permute.xlu0 %303 }
  0x9d   : > { %v322_v46 = vmul.f32 %v314_v12, %v308_v44  ;;  %v323_v47 = vmul.f32 %v315_v13, %v308_v44  ;;  %v320_v48 = vmul.f32 %v314_v12, %v304_v45  ;;  %v321_v49 = vmul.f32 %v315_v13, %v304_v45 }
  0x9f   : > { %v330_v50 = vadd.f32 %v322_v46, %v292_v42  ;;  %v331_v51 = vadd.f32 %v323_v47, %v293_v43  ;;  %v328_v52 = vadd.f32 %v320_v48, %v290_v40  ;;  %v329_v53 = vadd.f32 %v321_v49, %v291_v41 }
  0xa1   : > { %v343_v54 = vadd.f32 %v333_v21, %v330_v50  ;;  %v344_v55 = vadd.f32 %v334_v22, %v331_v51  ;;  %v341_v56 = vadd.f32 %v333_v21, %v328_v52  ;;  %v342_v57 = vadd.f32 %v334_v22, %v329_v53 }
  0xa2   : > { %360 = sbr.rel (!%p723_p4) target bundleno = 198 (0xc6), region = 36 }
  0xa3   : > { %351 = vst [vmem:[%s755_s11 + $0x30] sm:$0xff] %v343_v54 }
  0xa4   : > { %352 = vst [vmem:[%s755_s11 + $0x38] sm:$0xff] %v344_v55 }
  0xa5   : > { %349 = vst [vmem:[%s755_s11 + $0x20] sm:$0xff] %v341_v56 }
  0xa6   : > { %350 = vst [vmem:[%s755_s11 + $0x28] sm:$0xff] %v342_v57 }
  0xa7   : > { %s848_s19 = smov (!%p364_p12, %s363_s19), 4 }
  0xa8   : > { %s501_s21 = sshll.u32 %s848_s19, 4 }
  0xa9   : > { %s368_s23 = ssub.s32 64, %s501_s21 }
  0xaa   : > { %s369_s28 = sshll.u32 %s368_s23, 4 }
  0xab   : > { %370 = vsyncadd %s767_s18, %s369_s28  ;;  %p776_p13 = scmp.ne.s32.totalorder %s501_s21, 0  ;;  %s503_s22 = sshll.u32 %s648_s15, 6 }
  0xac   : > { %s375_s30 = scalar_lea.hbm %s836_s3, %s503_s22  ;;  %s377_s4 = sshll.u32 %s755_s11, 4  ;;  %s785_s4 = int_to_ptr.vmem [resolvable:$true] %s377_s4 }
  0xad   : > { %s379_s5 = sshll.u32 %s375_s30, 4  ;;  %s498_s6 = sshll.u32 %s848_s19, 8  ;;  %s787_s5 = int_to_ptr.hbm [resolvable:$true] %s379_s5 }
  0xae   : > { %s567_s7 = sshra.s32 %s785_s4, 4  ;;  %s569_s8 = sshrl.u32 %s498_s6, 4  ;;  %s568_s7 = int_to_ptr.vmem [resolvable:$true] %s567_s7 }
  0xaf   : > { %s574_s9 = scalar_lea.vmem %s568_s7, %s569_s8  ;;  %s660_s15 = smov [#allocation2]  }
  0xb0   : > { %p575_p0 = scmp.ne.s32.totalorder %s568_s7, %s574_s9  ;;  %s578_s10 = scalar_lea.vmem %s660_s15, 128 }
  0xb1   : > { %p580_p3 = scmp.lt.s32.totalorder %s578_s10, %s574_s9 }
  0xb2   : > { %p576_p1 = pnand %p575_p0, %p776_p13 }
  0xb4   : > { %p577_p2 = pneg %p576_p1 }
  0xb6   : > { %p582_p4 = pnand %p580_p3, %p577_p2 }
  0xb8   : > { %585 = shalt.err (!%p582_p4)
}
  0xb9   : > { %s586_s11 = sshra.s32 %s787_s5, 4  ;;  %s597_s22 = scalar_lea.hbm %s836_s3, 80  ;;  %s587_s11 = int_to_ptr.hbm [resolvable:$true] %s586_s11 }
  0xba   : > { %s593_s21 = scalar_lea.hbm %s587_s11, %s569_s8  ;;  %p598_p9 = scmp.lt.s32.totalorder %s587_s11, %s836_s3 }
  0xbb   : > { %p594_p5 = scmp.ne.s32.totalorder %s587_s11, %s593_s21  ;;  %p599_p10 = scmp.lt.s32.totalorder %s597_s22, %s593_s21 }
  0xbd   : > { %p595_p6 = pnand %p594_p5, %p776_p13  ;;  %p600_p11 = por %p599_p10, %p598_p9 }
  0xbf   : > { %p596_p7 = pneg %p595_p6 }
  0xc1   : > { %p601_p12 = pnand %p600_p11, %p596_p7 }
  0xc3   : > { %604 = shalt.err (!%p601_p12)
}
  0xc4   : > { %s661_s30 = smov 256   ;;  %s662_s7 = smov 16  }
  0xc5   : > { %385 = dma.vmem_to_hbm [thread:$0]  (%p776_p13), %s785_s4, %s498_s6, %s787_s5, %s767_s18, %s661_s30, %s661_s30, %s662_s7  }
  0xc6 PF: > { %p509_p0 = scmp.ge.s32.totalorder %s656_s17, 2  ;;  %s394_s8 = sand.u32 1, %s636_s12  }
  0xc7   : > { %s395_s9 = scalar_lea.sflag [#allocation3], %s394_s8 }
  0xc8   : > { %p506_p1 = pnand %p509_p0, %p730_p8 }
  0xca   : > { %p507_p2 = pneg %p506_p1 }
  0xcc   : > { %631 = dma.done.wait (%p507_p2), %s395_s9, 1024  }
  0xcd   : > { %633 = vsyncadd (%p507_p2), %s395_s9, 4294966272  ;;  %s16_s17 = sadd.s32 1, %s656_s17   ;;  %s840_s12 = smov %s640_s13 }
  0xce   : > { %p13_p3 = scmp.ge.s32.totalorder %s16_s17, 4   ;;  %s841_s13 = smov %s644_s14 }
  0xcf   : > { %s842_s14 = smov %s736_s25  ;;  %s843_s15 = smov %s652_s16 }
  0xd0   : > { %s844_s16 = smov %s846_s20  ;;  %15 = sbr.rel (!%p13_p3) target bundleno = 4 (0x4), region = 73 }
  0xd5   :  { %401 = vsyncpa [#allocation3], 1 }
  0xd6   :  { %403 = vsyncpa [#allocation3 + $0x1], 1 }

</bundles_post_ra>
